<compile_context>
chip_gen: v5e
topology: v5e:2x2
jax: 0.10.0
libtpu: 0.0.40
codegen_flags: <defaults>
</compile_context>

<pallas_src>
import math

import jax
import jax.numpy as jnp
from jax.experimental import pallas as pl
from jax.experimental.pallas import tpu as pltpu


def _mlp_kernel(x_ref, w1_ref, b1_ref, w2_ref, b2_ref, o_ref):
    # x_ref : (tm, d_model)     f32 row tile of the flattened input
    # w1_ref: (d_model, d_mlp)  bf16 W1^T (VMEM-resident across all grid steps)
    # b1_ref: (1, d_mlp)        f32
    # w2_ref: (d_mlp, d_model)  bf16 W2^T (VMEM-resident across all grid steps)
    # b2_ref: (1, d_model)      f32
    # o_ref : (tm, d_model)
    x = x_ref[...].astype(jnp.bfloat16)
    h = jnp.dot(x, w1_ref[...], preferred_element_type=jnp.float32) + b1_ref[...]
    h = jnp.maximum(h, 0.0).astype(jnp.bfloat16)   # ReLU (VPU), bf16 into 2nd MXU pass
    y = jnp.dot(h, w2_ref[...], preferred_element_type=jnp.float32) + b2_ref[...]
    o_ref[...] = y.astype(o_ref.dtype)


def _round_up(x, m):
    return ((x + m - 1) // m) * m


def _vmem_capacity_bytes():
    try:
        return int(pltpu.get_tpu_info().vmem_capacity_bytes)
    except Exception:
        return 64 * 1024 * 1024   # conservative (v7x per-TC capacity)


def _choose_tm(n, d_model, d_mlp, x_itemsize, out_itemsize, budget_bytes):
    """Largest MXU-friendly row-tile that fits the VMEM budget, with >=2 tiles."""
    w_itemsize = 2  # bf16 resident weights
    fixed = 2 * d_model * d_mlp * w_itemsize        # W1^T + W2^T (single-buffered)
    fixed += 4 * (d_mlp + d_model) * 2              # f32 biases (count 2 buffers)
    per_row = (
        2 * d_model * x_itemsize        # input tile, double-buffered
        + 2 * d_model * out_itemsize    # output tile, double-buffered
        + 2 * d_model                   # bf16 copy of x
        + 6 * d_mlp                     # h: f32 (4B) + bf16 copy (2B)
        + 4 * d_model                   # f32 y before cast
    )
    avail = budget_bytes - fixed
    if avail <= per_row * 8:
        # TODO(synk): weights that don't fit VMEM (very large d_mlp/d_model) need a
        # d_mlp-chunked grid axis with an f32 accumulator instead of resident weights.
        return 8
    tm_cap = max(8, min(1024, (avail // per_row) // 8 * 8))

    # At least 2 row tiles so v7x's two TensorCores both get work on the
    # "parallel" axis (harmless ~0.35us extra step on 1-TC chips).
    min_tiles = 2 if n >= 16 else 1
    tiles = max(min_tiles, pl.cdiv(n, tm_cap))
    tm = pl.cdiv(n, tiles)
    # MXU-friendly alignment (256-wide on v6e/v7x) while staying close to
    # n/tiles to avoid computing large all-padding row blocks.
    if tm >= 256:
        align = 256
    elif tm >= 128:
        align = 128
    else:
        align = 8
    tm = min(_round_up(tm, align), tm_cap)
    return max(tm, 8)


def mlp_block(E, w1, b1, w2, b2):
    """Fused MLP: relu(E @ w1.T + b1) @ w2.T + b2.

    E : (..., d_model)
    w1: (d_mlp, d_model), b1: (d_mlp,)    (PyTorch nn.Linear layout)
    w2: (d_model, d_mlp), b2: (d_model,)
    Returns same shape/dtype as E.
    """
    orig_shape = E.shape
    d_model = orig_shape[-1]
    d_mlp = w1.shape[0]
    assert w1.shape == (d_mlp, d_model)
    assert w2.shape == (d_model, d_mlp)
    assert b1.shape == (d_mlp,) and b2.shape == (d_model,)

    x = E.reshape(-1, d_model)
    n = x.shape[0]

    vmem_cap = _vmem_capacity_bytes()
    budget = int(0.85 * vmem_cap)
    tm = _choose_tm(n, d_model, d_mlp, x.dtype.itemsize, E.dtype.itemsize, budget)
    n_pad = pl.cdiv(n, tm) * tm
    if n_pad != n:
        x = jnp.pad(x, ((0, n_pad - n), (0, 0)))

    # bf16 weights feed the MXU at its native rate and halve resident VMEM;
    # biases stay f32 and are added to the f32 accumulator.
    w1t = w1.T.astype(jnp.bfloat16)        # (d_model, d_mlp)
    w2t = w2.T.astype(jnp.bfloat16)        # (d_mlp, d_model)
    b1r = b1.reshape(1, d_mlp).astype(jnp.float32)
    b2r = b2.reshape(1, d_model).astype(jnp.float32)

    grid = (n_pad // tm,)

    # Honest, itemsize-aware VMEM estimate (includes the f32 intermediate h),
    # with headroom, clamped below the physical per-core capacity.
    est = (
        2 * d_model * d_mlp * 2                                       # resident bf16 weights
        + 2 * tm * d_model * (x.dtype.itemsize + E.dtype.itemsize)    # in/out tiles, 2 bufs
        + tm * (6 * d_mlp + 6 * d_model)                              # h f32+bf16, x bf16, y f32
        + 4 * (d_mlp + d_model) * 2                                   # biases
    )
    vmem_limit = max(int(1.5 * est), 16 * 1024 * 1024)
    vmem_limit = min(vmem_limit, int(0.9 * vmem_cap))

    cost = pl.CostEstimate(
        flops=4 * n_pad * d_model * d_mlp,
        transcendentals=0,
        bytes_accessed=(
            n_pad * d_model * (x.dtype.itemsize + E.dtype.itemsize)
            + 2 * d_model * d_mlp * 2
        ),
    )

    out_shape = jax.ShapeDtypeStruct((n_pad, d_model), E.dtype)
    compiler_params = pltpu.CompilerParams(
        dimension_semantics=("parallel",),
        vmem_limit_bytes=vmem_limit,
    )

    def _run(single_buffer_weights):
        # Constant-index resident operands don't need double buffering.
        resident = (
            dict(pipeline_mode=pl.Buffered(buffer_count=1))
            if single_buffer_weights
            else {}
        )
        in_specs = [
            pl.BlockSpec((tm, d_model), lambda i: (i, 0)),
            pl.BlockSpec((d_model, d_mlp), lambda i: (0, 0), **resident),
            pl.BlockSpec((1, d_mlp), lambda i: (0, 0), **resident),
            pl.BlockSpec((d_mlp, d_model), lambda i: (0, 0), **resident),
            pl.BlockSpec((1, d_model), lambda i: (0, 0), **resident),
        ]
        out_specs = pl.BlockSpec((tm, d_model), lambda i: (i, 0))
        return pl.pallas_call(
            _mlp_kernel,
            out_shape=out_shape,
            grid=grid,
            in_specs=in_specs,
            out_specs=out_specs,
            compiler_params=compiler_params,
            cost_estimate=cost,
        )(x, w1t, b1r, w2t, b2r)

    try:
        out_flat = _run(True)       # single-buffered resident weights (halves VMEM)
    except Exception:
        out_flat = _run(False)      # fallback: default double-buffered pipelining

    return out_flat[:n].reshape(orig_shape)


if __name__ == "__main__":
    key = jax.random.PRNGKey(0)
    k_e, k_w1, k_b1, k_w2, k_b2 = jax.random.split(key, 5)

    # Small shapes consistent with the module; lane-aligned feature dims.
    B, S = 2, 8
    d_model = 128
    d_mlp = 256

    # PyTorch nn.Linear default init: U(-1/sqrt(fan_in), 1/sqrt(fan_in)).
    lim1 = 1.0 / math.sqrt(d_model)
    lim2 = 1.0 / math.sqrt(d_mlp)
    w1 = jax.random.uniform(k_w1, (d_mlp, d_model), jnp.float32, -lim1, lim1)
    b1 = jax.random.uniform(k_b1, (d_mlp,), jnp.float32, -lim1, lim1)
    w2 = jax.random.uniform(k_w2, (d_model, d_mlp), jnp.float32, -lim2, lim2)
    b2 = jax.random.uniform(k_b2, (d_model,), jnp.float32, -lim2, lim2)

    E = jax.random.normal(k_e, (B, S, d_model), dtype=jnp.float32)

    out = mlp_block(E, w1, b1, w2, b2)
    out = jax.block_until_ready(out)

    # Pure-JAX f32 reference (same math as the PyTorch module's forward).
    ref = jnp.maximum(E @ w1.T + b1, 0.0) @ w2.T + b2

    assert out.shape == E.shape
    # bf16 MXU inputs with f32 accumulation -> slightly looser tolerance vs f32 ref.
    max_err = float(jnp.max(jnp.abs(out - ref)))
    assert jnp.allclose(out, ref, atol=2e-2, rtol=2e-2), max_err

    print("KERNEL_OK")
</pallas_src>

<mosaic_0001>
module attributes {stable_mosaic.version = 11 : i64} {
  func.func @_mlp_kernel(%arg0: i32, %arg1: memref<8x128xf32, #tpu.memory_space<vmem>>, %arg2: memref<128x256xbf16, #tpu.memory_space<vmem>>, %arg3: memref<1x256xf32, #tpu.memory_space<vmem>>, %arg4: memref<256x128xbf16, #tpu.memory_space<vmem>>, %arg5: memref<1x128xf32, #tpu.memory_space<vmem>>, %arg6: memref<8x128xf32, #tpu.memory_space<vmem>>) attributes {dimension_semantics = [#tpu.dimension_semantics<parallel>], iteration_bounds = array<i64: 2>, scalar_prefetch = 0 : i64, scratch_operands = 0 : i64, tpu.core_type = #tpu.core_type<tc>, window_params = [{transform_indices = @transform_0, window_bounds = array<i64: 8, 128>}, {pipeline_mode = #tpu.pipeline_mode<synchronous>, transform_indices = @transform_1, window_bounds = array<i64: 128, 256>}, {pipeline_mode = #tpu.pipeline_mode<synchronous>, transform_indices = @transform_2, window_bounds = array<i64: 1, 256>}, {pipeline_mode = #tpu.pipeline_mode<synchronous>, transform_indices = @transform_3, window_bounds = array<i64: 256, 128>}, {pipeline_mode = #tpu.pipeline_mode<synchronous>, transform_indices = @transform_4, window_bounds = array<i64: 1, 128>}, {transform_indices = @transform_5, window_bounds = array<i64: 8, 128>}]} {
    %c0 = arith.constant 0 : index
    %c0_0 = arith.constant 0 : index
    %0 = vector.load %arg1[%c0, %c0_0] : memref<8x128xf32, #tpu.memory_space<vmem>>, vector<8x128xf32>
    %1 = arith.truncf %0 : vector<8x128xf32> to vector<8x128xbf16>
    %c0_1 = arith.constant 0 : index
    %c0_2 = arith.constant 0 : index
    %2 = vector.load %arg2[%c0_1, %c0_2] : memref<128x256xbf16, #tpu.memory_space<vmem>>, vector<128x256xbf16>
    %cst = arith.constant dense<0.000000e+00> : vector<8x256xf32>
    %3 = tpu.matmul %1, %2, %cst {dimension_numbers = #tpu.dot_dimension_numbers<[1], [0], [0], [1], [0, 0, 1, 1], [], []>} : vector<8x128xbf16>, vector<128x256xbf16>, vector<8x256xf32> -> vector<8x256xf32>
    %c0_3 = arith.constant 0 : index
    %c0_4 = arith.constant 0 : index
    %4 = vector.load %arg3[%c0_3, %c0_4] : memref<1x256xf32, #tpu.memory_space<vmem>>, vector<1x256xf32>
    %5 = vector.broadcast %4 : vector<1x256xf32> to vector<8x256xf32>
    %6 = arith.addf %3, %5 : vector<8x256xf32>
    %cst_5 = arith.constant 0.000000e+00 : f32
    %7 = vector.broadcast %cst_5 : f32 to vector<8x256xf32>
    %8 = arith.maximumf %6, %7 : vector<8x256xf32>
    %9 = arith.truncf %8 : vector<8x256xf32> to vector<8x256xbf16>
    %c0_6 = arith.constant 0 : index
    %c0_7 = arith.constant 0 : index
    %10 = vector.load %arg4[%c0_6, %c0_7] : memref<256x128xbf16, #tpu.memory_space<vmem>>, vector<256x128xbf16>
    %cst_8 = arith.constant dense<0.000000e+00> : vector<8x128xf32>
    %11 = tpu.matmul %9, %10, %cst_8 {dimension_numbers = #tpu.dot_dimension_numbers<[1], [0], [0], [1], [0, 0, 1, 1], [], []>} : vector<8x256xbf16>, vector<256x128xbf16>, vector<8x128xf32> -> vector<8x128xf32>
    %c0_9 = arith.constant 0 : index
    %c0_10 = arith.constant 0 : index
    %12 = vector.load %arg5[%c0_9, %c0_10] : memref<1x128xf32, #tpu.memory_space<vmem>>, vector<1x128xf32>
    %13 = vector.broadcast %12 : vector<1x128xf32> to vector<8x128xf32>
    %14 = arith.addf %11, %13 : vector<8x128xf32>
    %c0_11 = arith.constant 0 : index
    %c0_12 = arith.constant 0 : index
    %15 = vector.load %arg6[%c0_11, %c0_12] : memref<8x128xf32, #tpu.memory_space<vmem>>, vector<8x128xf32>
    tpu.vector_store %arg6[%c0_11, %c0_12], %14 {strides = array<i32>} : memref<8x128xf32, #tpu.memory_space<vmem>>, vector<8x128xf32>,
    return
  }
  func.func @transform_0(%arg0: i32) -> (i32, i32) {
    %c0_i32 = arith.constant 0 : i32
    %c0_i32_0 = arith.constant 0 : i32
    return %arg0, %c0_i32 : i32, i32
  }
  func.func @transform_1(%arg0: i32) -> (i32, i32) {
    %c0_i32 = arith.constant 0 : i32
    %c0_i32_0 = arith.constant 0 : i32
    %c0_i32_1 = arith.constant 0 : i32
    return %c0_i32, %c0_i32_0 : i32, i32
  }
  func.func @transform_2(%arg0: i32) -> (i32, i32) {
    %c0_i32 = arith.constant 0 : i32
    %c0_i32_0 = arith.constant 0 : i32
    %c0_i32_1 = arith.constant 0 : i32
    return %c0_i32, %c0_i32_0 : i32, i32
  }
  func.func @transform_3(%arg0: i32) -> (i32, i32) {
    %c0_i32 = arith.constant 0 : i32
    %c0_i32_0 = arith.constant 0 : i32
    %c0_i32_1 = arith.constant 0 : i32
    return %c0_i32, %c0_i32_0 : i32, i32
  }
  func.func @transform_4(%arg0: i32) -> (i32, i32) {
    %c0_i32 = arith.constant 0 : i32
    %c0_i32_0 = arith.constant 0 : i32
    %c0_i32_1 = arith.constant 0 : i32
    return %c0_i32, %c0_i32_0 : i32, i32
  }
  func.func @transform_5(%arg0: i32) -> (i32, i32) {
    %c0_i32 = arith.constant 0 : i32
    %c0_i32_0 = arith.constant 0 : i32
    return %arg0, %c0_i32 : i32, i32
  }
}

module attributes {stable_mosaic.version = 11 : i64} {
  func.func @_mlp_kernel(%arg0: i32, %arg1: memref<8x128xf32, #tpu.memory_space<vmem>>, %arg2: memref<128x256xbf16, #tpu.memory_space<vmem>>, %arg3: memref<1x256xf32, #tpu.memory_space<vmem>>, %arg4: memref<256x128xbf16, #tpu.memory_space<vmem>>, %arg5: memref<1x128xf32, #tpu.memory_space<vmem>>, %arg6: memref<8x128xf32, #tpu.memory_space<vmem>>) attributes {dimension_semantics = [#tpu.dimension_semantics<parallel>], iteration_bounds = array<i64: 2>, scalar_prefetch = 0 : i64, scratch_operands = 0 : i64, tpu.core_type = #tpu.core_type<tc>, window_params = [{transform_indices = @transform_0, window_bounds = array<i64: 8, 128>}, {pipeline_mode = #tpu.pipeline_mode<synchronous>, transform_indices = @transform_1, window_bounds = array<i64: 128, 256>}, {pipeline_mode = #tpu.pipeline_mode<synchronous>, transform_indices = @transform_2, window_bounds = array<i64: 1, 256>}, {pipeline_mode = #tpu.pipeline_mode<synchronous>, transform_indices = @transform_3, window_bounds = array<i64: 256, 128>}, {pipeline_mode = #tpu.pipeline_mode<synchronous>, transform_indices = @transform_4, window_bounds = array<i64: 1, 128>}, {transform_indices = @transform_5, window_bounds = array<i64: 8, 128>}]} {
    %c0 = arith.constant 0 : index
    %c0_0 = arith.constant 0 : index
    %0 = vector.load %arg1[%c0, %c0_0] : memref<8x128xf32, #tpu.memory_space<vmem>>, vector<8x128xf32>
    %1 = arith.truncf %0 : vector<8x128xf32> to vector<8x128xbf16>
    %c0_1 = arith.constant 0 : index
    %c0_2 = arith.constant 0 : index
    %2 = vector.load %arg2[%c0_1, %c0_2] : memref<128x256xbf16, #tpu.memory_space<vmem>>, vector<128x256xbf16>
    %cst = arith.constant dense<0.000000e+00> : vector<8x256xf32>
    %3 = tpu.matmul %1, %2, %cst {dimension_numbers = #tpu.dot_dimension_numbers<[1], [0], [0], [1], [0, 0, 1, 1], [], []>} : vector<8x128xbf16>, vector<128x256xbf16>, vector<8x256xf32> -> vector<8x256xf32>
    %c0_3 = arith.constant 0 : index
    %c0_4 = arith.constant 0 : index
    %4 = vector.load %arg3[%c0_3, %c0_4] : memref<1x256xf32, #tpu.memory_space<vmem>>, vector<1x256xf32>
    %5 = vector.broadcast %4 : vector<1x256xf32> to vector<8x256xf32>
    %6 = arith.addf %3, %5 : vector<8x256xf32>
    %cst_5 = arith.constant 0.000000e+00 : f32
    %7 = vector.broadcast %cst_5 : f32 to vector<8x256xf32>
    %8 = arith.maximumf %6, %7 : vector<8x256xf32>
    %9 = arith.truncf %8 : vector<8x256xf32> to vector<8x256xbf16>
    %c0_6 = arith.constant 0 : index
    %c0_7 = arith.constant 0 : index
    %10 = vector.load %arg4[%c0_6, %c0_7] : memref<256x128xbf16, #tpu.memory_space<vmem>>, vector<256x128xbf16>
    %cst_8 = arith.constant dense<0.000000e+00> : vector<8x128xf32>
    %11 = tpu.matmul %9, %10, %cst_8 {dimension_numbers = #tpu.dot_dimension_numbers<[1], [0], [0], [1], [0, 0, 1, 1], [], []>} : vector<8x256xbf16>, vector<256x128xbf16>, vector<8x128xf32> -> vector<8x128xf32>
    %c0_9 = arith.constant 0 : index
    %c0_10 = arith.constant 0 : index
    %12 = vector.load %arg5[%c0_9, %c0_10] : memref<1x128xf32, #tpu.memory_space<vmem>>, vector<1x128xf32>
    %13 = vector.broadcast %12 : vector<1x128xf32> to vector<8x128xf32>
    %14 = arith.addf %11, %13 : vector<8x128xf32>
    %c0_11 = arith.constant 0 : index
    %c0_12 = arith.constant 0 : index
    %15 = vector.load %arg6[%c0_11, %c0_12] : memref<8x128xf32, #tpu.memory_space<vmem>>, vector<8x128xf32>
    tpu.vector_store %arg6[%c0_11, %c0_12], %14 {strides = array<i32>} : memref<8x128xf32, #tpu.memory_space<vmem>>, vector<8x128xf32>,
    return
  }
  func.func @transform_0(%arg0: i32) -> (i32, i32) {
    %c0_i32 = arith.constant 0 : i32
    %c0_i32_0 = arith.constant 0 : i32
    return %arg0, %c0_i32 : i32, i32
  }
  func.func @transform_1(%arg0: i32) -> (i32, i32) {
    %c0_i32 = arith.constant 0 : i32
    %c0_i32_0 = arith.constant 0 : i32
    %c0_i32_1 = arith.constant 0 : i32
    return %c0_i32, %c0_i32_0 : i32, i32
  }
  func.func @transform_2(%arg0: i32) -> (i32, i32) {
    %c0_i32 = arith.constant 0 : i32
    %c0_i32_0 = arith.constant 0 : i32
    %c0_i32_1 = arith.constant 0 : i32
    return %c0_i32, %c0_i32_0 : i32, i32
  }
  func.func @transform_3(%arg0: i32) -> (i32, i32) {
    %c0_i32 = arith.constant 0 : i32
    %c0_i32_0 = arith.constant 0 : i32
    %c0_i32_1 = arith.constant 0 : i32
    return %c0_i32, %c0_i32_0 : i32, i32
  }
  func.func @transform_4(%arg0: i32) -> (i32, i32) {
    %c0_i32 = arith.constant 0 : i32
    %c0_i32_0 = arith.constant 0 : i32
    %c0_i32_1 = arith.constant 0 : i32
    return %c0_i32, %c0_i32_0 : i32, i32
  }
  func.func @transform_5(%arg0: i32) -> (i32, i32) {
    %c0_i32 = arith.constant 0 : i32
    %c0_i32_0 = arith.constant 0 : i32
    return %arg0, %c0_i32 : i32, i32
  }
}

</mosaic_0001>

<bundles_post_ra>
// kernel: tpu_custom_call.1
= control target key start
LH: loop header
LB: loop body
LE: loop exit
PB: predicated region body
PF: predicated region fallthrough
CT: control target
= control target key end

     0   :  { %10 = vsyncpa [#allocation3], 0  ;;  %s1357_s0 = inlined_call_operand.hbm [shape: f32[16,128], index: 0, kind: input, shape index: {}]   ;;  %s1358_s1 = inlined_call_operand.hbm [shape: bf16[128,256], index: 1, kind: input, shape index: {}]   ;;  %s1359_s2 = inlined_call_operand.hbm [shape: f32[1,256], index: 2, kind: input, shape index: {}]   ;;  %s1360_s3 = inlined_call_operand.hbm [shape: bf16[256,128], index: 3, kind: input, shape index: {}]   ;;  %s1361_s4 = inlined_call_operand.vmem [shape: f32[1,128], index: 4, kind: input, shape index: {}]   ;;  %s1362_s5 = inlined_call_operand.hbm [shape: f32[16,128], index: 5, kind: output, shape index: {}]  }
   0x1   :  { %12 = vsyncpa [#allocation3 + $0x1], 0 }
   0x2   :  { %13 = vsyncpa [#allocation6], 0 }
   0x3   :  { %14 = vsyncpa [#allocation9], 0 }
   0x4   :  { %15 = vsyncpa [#allocation4], 0 }
   0x5   :  { %17 = vsyncpa [#allocation4 + $0x1], 0  ;;  %s1191_s18 = smov 0   ;;  %s1193_s19 = smov 0  }
   0x6   :  { %s1195_s20 = smov 0   ;;  %s1197_s21 = smov 0  }
   0x7 LB: > { %s175_s24 = sshll.u32 %s1358_s1, 4  ;;  %s1215_s25 = sadd.s32 4294967295, %s1152_s21   ;;  %s1152_s21 = sphi %s1197_s21, %s1373_s21   ;;  %s1148_s20 = sphi %s1195_s20, %s1372_s20   ;;  %s1144_s19 = sphi %s1193_s19, %s1371_s19   ;;  %s1140_s18 = sphi %s1191_s18, %s1370_s18   ;;  %s176_s24 = int_to_ptr.hbm [resolvable:$true] %s175_s24 }
   0x8   : > { %p699_p0 = scmp.ge.s32.totalorder %s1152_s21, 1  ;;  %p44_p1 = scmp.eq.s32.totalorder %s1215_s25, 0 }
   0x9   : > { %p164_p2 = scmp.lt.s32.totalorder %s1152_s21, 3  ;;  %s1154_s27 = smov [#allocation5]  }
   0xa   : > { %s177_s28 = sshll.u32 %s1154_s27, 4  ;;  %s190_s6 = sshll.u32 %s1359_s2, 4  ;;  %s178_s28 = int_to_ptr.vmem [resolvable:$true] %s177_s28  ;;  %s191_s6 = int_to_ptr.hbm [resolvable:$true] %s190_s6 }
   0xb   : > { %p1220_p3 = pnand %p699_p0, %p164_p2  ;;  %s201_s10 = sshll.u32 %s1360_s3, 4  ;;  %s202_s10 = int_to_ptr.hbm [resolvable:$true] %s201_s10 }
   0xc   : > { %s1155_s11 = smov [#allocation7]   ;;  %s1156_s13 = smov 128  }
   0xd   : > { %p892_p4 = pneg %p1220_p3  ;;  %s192_s12 = sshll.u32 %s1155_s11, 4  ;;  %s193_s12 = int_to_ptr.vmem [resolvable:$true] %s192_s12 }
   0xe   : > { %s1157_s14 = smov 8   ;;  %s1158_s15 = smov [#allocation8]  }
   0xf   : > { %p1232_p6 = pnand %p892_p4, %p44_p1  ;;  %s203_s16 = sshll.u32 %s1158_s15, 4  ;;  %s204_s16 = int_to_ptr.vmem [resolvable:$true] %s203_s16 }
  0x10   : > { %s1159_s17 = smov 64   ;;  %s1160_s22 = smov 4  }
  0x11   : > { %895 = dma.hbm_to_vmem [thread:$0]  (!%p1232_p6), %s176_s24, 2048, %s178_s28, [#allocation6], %s1156_s13, %s1156_s13, %s1157_s14  }
  0x12   : > { %898 = dma.hbm_to_vmem [thread:$0]  (!%p1232_p6), %s191_s6, 32, %s193_s12, [#allocation6]  }
  0x13   : > { %901 = dma.hbm_to_vmem [thread:$0]  (!%p1232_p6), %s202_s10, 2048, %s204_s16, [#allocation9], %s1159_s17, %s1159_s17, %s1160_s22  }
  0x14   : > { %s698_s23 = sadd.s32 4294967294, %s1152_s21   ;;  %s1247_s24 = sadd.s32 1, %s1152_s21  }
  0x15   : > { %s30_s27 = sadd.s32 1, %s1148_s20  ;;  %s27_s28 = ssub.s32 %s1152_s21, %s1247_s24 }
  0x16   : > { %p37_p7 = scmp.ne.s32.totalorder %s1148_s20, %s1144_s19  ;;  %p28_p8 = scmp.eq.s32.totalorder %s27_s28, 0 }
  0x17   : > { %p38_p9 = scmp.eq.s32.totalorder %s1152_s21, 0  ;;  %p43_p10 = scmp.ne.s32.totalorder %s1144_s19, %s1140_s18 }
  0x18   : > { %p151_p11 = scmp.eq.s32.totalorder %s1215_s25, 1  ;;  %p157_p0 = scmp.eq.s32.totalorder %s698_s23, 1 }
  0x19   : > { %s1259_s29 = scalar_select %p28_p8, %s1148_s20, %s30_s27  }
  0x1a   : > { %p1263_p12 = por %p44_p1, %p43_p10  ;;  %p1267_p13 = por %p151_p11, %p37_p7 }
  0x1b   : > { %p39_p2 = por %p38_p9, %p37_p7  ;;  %s220_s7 = sand.u32 1, %s1148_s20  }
  0x1c   : > { %p1272_p4 = por %p157_p0, %p43_p10  ;;  %p913_p6 = scmp.lt.s32.totalorder %s1152_s21, 2 }
  0x1d   : > { %s704_s9 = sshll.u32 %s220_s7, 3  ;;  %s705_s10 = sshll.u32 %s1152_s21, 3 }
  0x1e   : > { %s228_s13 = scalar_lea.hbm %s1357_s0, %s705_s10  ;;  %s224_s15 = scalar_lea.vmem [#allocation2], %s704_s9 }
  0x1f   : > { %s230_s14 = sshll.u32 %s228_s13, 4  ;;  %s232_s16 = sshll.u32 %s224_s15, 4  ;;  %s231_s14 = int_to_ptr.hbm [resolvable:$true] %s230_s14  ;;  %s233_s16 = int_to_ptr.vmem [resolvable:$true] %s232_s16 }
  0x20   : > { %p1281_p8 = pnand %p913_p6, %p39_p2  ;;  %s221_s22 = scalar_lea.sflag [#allocation3], %s220_s7 }
  0x21   : > { %s1048_s23 = sshra.s32 %s231_s14, 4  ;;  %s1055_s9 = scalar_lea.hbm %s1357_s0, 16  ;;  %s1049_s23 = int_to_ptr.hbm [resolvable:$true] %s1048_s23 }
  0x22   : > { %s1050_s27 = scalar_lea.hbm %s1049_s23, 8  ;;  %p1052_p9 = pneg %p1281_p8 }
  0x23   : > { %p1051_p7 = scmp.ne.s32.totalorder %s1049_s23, %s1050_s27  ;;  %p1056_p0 = scmp.lt.s32.totalorder %s1049_s23, %s1357_s0 }
  0x24   : > { %p1057_p2 = scmp.lt.s32.totalorder %s1055_s9, %s1050_s27 }
  0x25   : > { %p1053_p10 = pnand %p1052_p9, %p1051_p7 }
  0x26   : > { %p1058_p6 = por %p1057_p2, %p1056_p0 }
  0x27   : > { %p1054_p11 = pneg %p1053_p10 }
  0x29   : > { %p1059_p5 = pnand %p1058_p6, %p1054_p11 }
  0x2b   : > { %1062 = shalt.err (!%p1059_p5)
}
  0x2c   : > { %905 = dma.hbm_to_vmem [thread:$0]  (!%p1281_p8), %s231_s14, 128, %s233_s16, %s221_s22  }
  0x2d   : > { %241 = sbr.rel (%p1220_p3) target bundleno = 362 (0x16a), region = 40  ;;  %s1298_s7 = sand.u32 (!%p1220_p3), 1, %s1144_s19  }
  0x2e   : > { %s707_s13 = sshll.u32 (!%p1220_p3), %s1298_s7, 3  ;;  %s244_s15 = scalar_lea.sflag (!%p1220_p3), [#allocation3], %s1298_s7 }
  0x2f   : > { %s1304_s23 = scalar_lea.vmem (!%p1220_p3), [#allocation2], %s707_s13 }
  0x32   : > { %1123 = dma.done.wait (%p1263_p12), %s244_s15, 128  }
  0x33   : > { %1125 = vsyncadd (%p1263_p12), %s244_s15, 4294967168 }
  0x34   : > { %1127 = dma.done.wait (%p44_p1), [#allocation6], 2080  }
  0x35   : > { %1129 = vsyncadd (%p44_p1), [#allocation6], 4294965216 }
  0x36   : > { %1131 = dma.done.wait (%p44_p1), [#allocation9], 2048  }
  0x37   : > { %1133 = vsyncadd (%p44_p1), [#allocation9], 4294965248  ;;  %v770_v0 = vld [vmem:[#allocation5 + $0x70] sm:$0xf]  ;;  %v859_v1 = vld [vmem:[#allocation5 + $0x74] sm:$0xf0] }
  0x38   : > { %v858_v2 = vld [vmem:[#allocation5 + $0x74] sm:$0xf]  ;;  %v771_v3 = vor.u32 %v859_v1, %v770_v0  ;;  %v772_v4 = vld [vmem:[#allocation5 + $0x78] sm:$0xf0]  ;;  %v762_v5 = vld [vmem:[#allocation5 + $0x60] sm:$0xf] }
  0x39   : > { %v857_v6 = vld [vmem:[#allocation5 + $0x64] sm:$0xf0]  ;;  %v775_v7 = vor.u32 %v858_v2, %v772_v4  ;;  %v856_v8 = vld [vmem:[#allocation5 + $0x64] sm:$0xf]  ;;  %v764_v9 = vld [vmem:[#allocation5 + $0x68] sm:$0xf0] }
  0x3a   : > { %394 = vmatpush.bf16.msra.mxu0 %v771_v3  ;;  %v763_v10 = vor.u32 %v857_v6, %v762_v5  ;;  %v767_v11 = vor.u32 %v856_v8, %v764_v9  ;;  %v754_v12 = vld [vmem:[#allocation5 + $0x50] sm:$0xf]  ;;  %v855_v13 = vld [vmem:[#allocation5 + $0x54] sm:$0xf0]  ;;  %v854_v14 = vld [vmem:[#allocation5 + $0x54] sm:$0xf] }
  0x3b   : > { %407 = vmatpush.bf16.msra.mxu1 %v775_v7  ;;  %v756_v15 = vld [vmem:[#allocation5 + $0x58] sm:$0xf0]  ;;  %v755_v16 = vor.u32 %v855_v13, %v754_v12  ;;  %v746_v18 = vld [vmem:[#allocation5 + $0x40] sm:$0xf]  ;;  %v853_v19 = vld [vmem:[#allocation5 + $0x44] sm:$0xf0] }
  0x3c   : > { %v759_v17 = vor.u32 %v854_v14, %v756_v15  ;;  %v852_v20 = vld [vmem:[#allocation5 + $0x44] sm:$0xf]  ;;  %v748_v21 = vld [vmem:[#allocation5 + $0x48] sm:$0xf0]  ;;  %v747_v22 = vor.u32 %v853_v19, %v746_v18  ;;  %v867_v23 = vld [vmem:[#allocation8 + $0x38] sm:$0xff]  ;;  %s841_s26 = sshll.u32 %s1215_s25, 3 }
  0x3d   : > { %v875_v24 = vld [vmem:[#allocation8 + $0x78] sm:$0xff]  ;;  %v751_v25 = vor.u32 %v852_v20, %v748_v21  ;;  %v738_v26 = vld [vmem:[#allocation5 + $0x30] sm:$0xf]  ;;  %v850_v28 = vld [vmem:[#allocation5 + $0x34] sm:$0xf]  ;;  %556 = vmatpush.bf16.msra.mxu2 %v867_v23  ;;  %s594_s22 = scalar_lea.hbm %s1362_s5, %s841_s26  ;;  %s289_s27 = scalar_lea.vmem [#allocation10], %s707_s13 }
  0x3e   : > { %395 = vmatpush.bf16.msra.mxu0 %v763_v10  ;;  %v851_v27 = vld [vmem:[#allocation5 + $0x34] sm:$0xf0]  ;;  %v740_v29 = vld [vmem:[#allocation5 + $0x38] sm:$0xf0]  ;;  %569 = vmatpush.bf16.msra.mxu3 %v875_v24  ;;  %v730_v34 = vld [vmem:[#allocation5 + $0x20] sm:$0xf] }
  0x3f   : > { %408 = vmatpush.bf16.msra.mxu1 %v767_v11  ;;  %v866_v30 = vld [vmem:[#allocation8 + $0x30] sm:$0xff]  ;;  %v739_v32 = vor.u32 %v851_v27, %v738_v26  ;;  %v743_v33 = vor.u32 %v850_v28, %v740_v29  ;;  %v849_v35 = vld [vmem:[#allocation5 + $0x24] sm:$0xf0]  ;;  %v848_v36 = vld [vmem:[#allocation5 + $0x24] sm:$0xf]  ;;  %s596_s28 = sshll.u32 %s289_s27, 4  ;;  %s597_s28 = int_to_ptr.vmem [resolvable:$true] %s596_s28 }
  0x40   : > { %v874_v31 = vld [vmem:[#allocation8 + $0x70] sm:$0xff]  ;;  %v732_v37 = vld [vmem:[#allocation5 + $0x28] sm:$0xf0]  ;;  %v731_v40 = vor.u32 %v849_v35, %v730_v34  ;;  %v724_v45 = vld [vmem:[#allocation5 + $0x18] sm:$0xf0]  ;;  %s598_s10 = sshll.u32 %s594_s22, 4  ;;  %s599_s10 = int_to_ptr.hbm [resolvable:$true] %s598_s10 }
  0x41   : > { %557 = vmatpush.bf16.msra.mxu2 %v866_v30  ;;  %v865_v38 = vld [vmem:[#allocation8 + $0x28] sm:$0xff]  ;;  %v735_v41 = vor.u32 %v848_v36, %v732_v37  ;;  %v847_v43 = vld [vmem:[#allocation5 + $0x14] sm:$0xf0]  ;;  %v846_v44 = vld [vmem:[#allocation5 + $0x14] sm:$0xf]  ;;  %s584_s25 = scalar_lea.sflag [#allocation4], %s1298_s7 }
  0x42   : > { %396 = vmatpush.bf16.msra.mxu0 %v755_v16  ;;  %570 = vmatpush.bf16.msra.mxu3 %v874_v31  ;;  %v873_v39 = vld [vmem:[#allocation8 + $0x68] sm:$0xff]  ;;  %v864_v46 = vld [vmem:[#allocation8 + $0x20] sm:$0xff]  ;;  %v727_v49 = vor.u32 %v846_v44, %v724_v45  ;;  %v863_v54 = vld [vmem:[#allocation8 + $0x18] sm:$0xff]  ;;  %s1092_s9 = sshra.s32 %s599_s10, 4  ;;  %s1098_s13 = scalar_lea.hbm %s1362_s5, 16  ;;  %s1093_s9 = int_to_ptr.hbm [resolvable:$true] %s1092_s9 }
  0x43   : > { %409 = vmatpush.bf16.msra.mxu1 %v759_v17  ;;  %v722_v42 = vld [vmem:[#allocation5 + $0x10] sm:$0xf]  ;;  %v872_v47 = vld [vmem:[#allocation8 + $0x60] sm:$0xff]  ;;  %v716_v53 = vld [vmem:[#allocation5 + $0x8] sm:$0xf0]  ;;  %s1094_s11 = scalar_lea.hbm %s1093_s9, 8  ;;  %p1099_p12 = scmp.lt.s32.totalorder %s1093_s9, %s1362_s5 }
  0x44   : > { %v723_v48 = vor.u32 %v847_v43, %v722_v42  ;;  %v714_v50 = vld [vmem:[#allocation5] sm:$0xf]  ;;  %v845_v51 = vld [vmem:[#allocation5 + $0x4] sm:$0xf0]  ;;  %v844_v52 = vld [vmem:[#allocation5 + $0x4] sm:$0xf]  ;;  %p1095_p1 = scmp.ne.s32.totalorder %s1093_s9, %s1094_s11  ;;  %p1100_p8 = scmp.lt.s32.totalorder %s1098_s13, %s1094_s11 }
  0x45   : > { %558 = vmatpush.bf16.msra.mxu2 %v865_v38  ;;  %v871_v55 = vld [vmem:[#allocation8 + $0x58] sm:$0xff]  ;;  %v715_v56 = vor.u32 %v845_v51, %v714_v50  ;;  %v719_v58 = vor.u32 %v844_v52, %v716_v53  ;;  %v862_v59 = vld [vmem:[#allocation8 + $0x10] sm:$0xff]  ;;  %v861_v62 = vld [vmem:[#allocation8 + $0x8] sm:$0xff] }
  0x46   : > { %397 = vmatpush.bf16.msra.mxu0 %v747_v22  ;;  %571 = vmatpush.bf16.msra.mxu3 %v873_v39  ;;  %v290_v57 = vld [vmem:[%s1304_s23] sm:$0xff]  ;;  %v860_v0 = vld [vmem:[#allocation8] sm:$0xff]  ;;  %v308_v2 = vld [vmem:[#allocation7] sm:$0x3]  ;;  %p1096_p3 = pnand %p1095_p1, %p1267_p13  ;;  %p1101_p7 = por %p1100_p8, %p1099_p12 }
  0x47   : > { %410 = vmatpush.bf16.msra.mxu1 %v751_v25  ;;  %v870_v60 = vld [vmem:[#allocation8 + $0x50] sm:$0xff]  ;;  %v291_v61 = vpack.c.bf16 %v290_v57, %v290_v57  ;;  %v869_v63 = vld [vmem:[#allocation8 + $0x48] sm:$0xff]  ;;  %v868_v1 = vld [vmem:[#allocation8 + $0x40] sm:$0xff]  ;;  %v310_v3 = vperm.slane %v308_v2, 0  ;;  %v311_v4 = vperm.slane %v308_v2, 1 }
  0x48   : > { %v957_v15 = vld [vmem:[%s1361_s4] ss:$0 sm:$0xff]  ;;  %p1097_p5 = pneg %p1096_p3 }
  0x49   : > { %559 = vmatpush.bf16.msra.mxu2 %v864_v46 }
  0x4a   : > { %398 = vmatpush.bf16.msra.mxu0 %v739_v32  ;;  %572 = vmatpush.bf16.msra.mxu3 %v872_v47  ;;  %p1102_p9 = pnand %p1101_p7, %p1097_p5 }
  0x4b   : > { %411 = vmatpush.bf16.msra.mxu1 %v743_v33 }
  0x4d   : > { %560 = vmatpush.bf16.msra.mxu2 %v863_v54 }
  0x4e   : > { %399 = vmatpush.bf16.msra.mxu0 %v731_v40  ;;  %573 = vmatpush.bf16.msra.mxu3 %v871_v55 }
  0x4f   : > { %412 = vmatpush.bf16.msra.mxu1 %v735_v41 }
  0x51   : > { %561 = vmatpush.bf16.msra.mxu2 %v862_v59 }
  0x52   : > { %400 = vmatpush.bf16.msra.mxu0 %v723_v48  ;;  %574 = vmatpush.bf16.msra.mxu3 %v870_v60 }
  0x53   : > { %413 = vmatpush.bf16.msra.mxu1 %v727_v49 }
  0x55   : > { %562 = vmatpush.bf16.msra.mxu2 %v861_v62 }
  0x56   : > { %401 = vmatpush.bf16.msra.mxu0 %v715_v56  ;;  %575 = vmatpush.bf16.msra.mxu3 %v869_v63 }
  0x57   : > { %414 = vmatpush.bf16.msra.mxu1 %v719_v58 }
  0x59   : > { %402 = vmatmul.bf16.vlgmr.msra.gmra.mxu0 %v291_v61  ;;  %563 = vmatpush.bf16.msra.mxu2 %v860_v0 }
  0x5a   : > { %415 = vmatmul.bf16.vlgmr.msra.gmra.mxu1 %v291_v61  ;;  %576 = vmatpush.bf16.msra.mxu3 %v868_v1 }
  0xd6   : > { %v403_v5 = vpop.f32.mrf.mxu0 }
  0xd7   : > { %v404_v6 = vadd.f32 %v403_v5, %v310_v3  ;;  %v416_v7 = vpop.f32.mrf.mxu1 }
  0xd8   : > { %v417_v8 = vadd.f32 %v416_v7, %v311_v4 }
  0xd9   : > { %v420_v9 = vmax.f32 %v404_v6, 0.0 }
  0xda   : > { %v421_v10 = vmax.f32 %v417_v8, 0.0 }
  0xdb   : > { %v422_v11 = vpack.c.bf16 %v420_v9, %v420_v9 }
  0xdc   : > { %v423_v12 = vpack.c.bf16 %v421_v10, %v421_v10 }
  0xdd   : > { %564 = vmatmul.bf16.vlgmr.msra.gmra.mxu2 %v422_v11 }
  0xde   : > { %577 = vmatmul.bf16.vlgmr.msra.gmra.mxu3 %v423_v12  ;;  %v405_v13 = vpop.f32.mrf.mxu0 }
  0xdf   : > { %v418_v14 = vpop.f32.mrf.mxu1 }
 0x160   : > { %v565_v16 = vpop.f32.mrf.mxu2 }
 0x161   : > { %v566_v17 = vadd.f32 %v957_v15, %v565_v16  ;;  %v578_v18 = vpop.f32.mrf.mxu3 }
 0x163   : > { %v579_v19 = vadd.f32 %v578_v18, %v566_v17 }
 0x165   : > { %582 = vst [vmem:[%s289_s27] sm:$0xff] %v579_v19 }
 0x166   : > { %1105 = shalt.err (!%p1102_p9)
}
 0x167   : > { %890 = dma.vmem_to_hbm [thread:$0]  (%p1267_p13), %s597_s28, 128, %s599_s10, %s584_s25  }
 0x168   : > { %v567_v20 = vpop.f32.mrf.mxu2 }
 0x169   : > { %v580_v21 = vpop.f32.mrf.mxu3 }
 0x16a PF: > { %s610_s7 = sand.u32 1, %s1140_s18   ;;  %p1369_p10 = scmp.ge.s32.totalorder %s1152_s21, 2 }
 0x16b   : > { %s611_s30 = scalar_lea.sflag [#allocation4], %s610_s7 }
 0x16c   : > { %p907_p11 = pnand %p1369_p10, %p1272_p4 }
 0x16e   : > { %p908_p0 = pneg %p907_p11 }
 0x170   : > { %1135 = dma.done.wait (%p908_p0), %s611_s30, 128  }
 0x171   : > { %1137 = vsyncadd (%p908_p0), %s611_s30, 4294967168  ;;  %p20_p13 = scmp.ge.s32.totalorder %s1247_s24, 4   ;;  %s1370_s18 = smov %s1144_s19 }
 0x172   : > { %s1371_s19 = smov %s1148_s20  ;;  %s1372_s20 = smov %s1259_s29 }
 0x173   : > { %s1373_s21 = smov %s1247_s24  ;;  %22 = sbr.rel (!%p20_p13) target bundleno = 7 (0x7), region = 97 }
 0x178   :  { %617 = vsyncpa [#allocation3], 1 }
 0x179   :  { %619 = vsyncpa [#allocation3 + $0x1], 1 }
 0x17a   :  { %620 = vsyncpa [#allocation6], 1 }
 0x17b   :  { %621 = vsyncpa [#allocation9], 1 }
 0x17c   :  { %622 = vsyncpa [#allocation4], 1 }
 0x17d   :  { %624 = vsyncpa [#allocation4 + $0x1], 1 }

// kernel: tpu_custom_call.1
= control target key start
LH: loop header
LB: loop body
LE: loop exit
PB: predicated region body
PF: predicated region fallthrough
CT: control target
= control target key end

     0   :  { %10 = vsyncpa [#allocation3], 0  ;;  %s1357_s0 = inlined_call_operand.hbm [shape: f32[16,128], index: 0, kind: input, shape index: {}]   ;;  %s1358_s1 = inlined_call_operand.hbm [shape: bf16[128,256], index: 1, kind: input, shape index: {}]   ;;  %s1359_s2 = inlined_call_operand.hbm [shape: f32[1,256], index: 2, kind: input, shape index: {}]   ;;  %s1360_s3 = inlined_call_operand.hbm [shape: bf16[256,128], index: 3, kind: input, shape index: {}]   ;;  %s1361_s4 = inlined_call_operand.vmem [shape: f32[1,128], index: 4, kind: input, shape index: {}]   ;;  %s1362_s5 = inlined_call_operand.hbm [shape: f32[16,128], index: 5, kind: output, shape index: {}]  }
   0x1   :  { %12 = vsyncpa [#allocation3 + $0x1], 0 }
   0x2   :  { %13 = vsyncpa [#allocation6], 0 }
   0x3   :  { %14 = vsyncpa [#allocation9], 0 }
   0x4   :  { %15 = vsyncpa [#allocation4], 0 }
   0x5   :  { %17 = vsyncpa [#allocation4 + $0x1], 0  ;;  %s1191_s18 = smov 0   ;;  %s1193_s19 = smov 0  }
   0x6   :  { %s1195_s20 = smov 0   ;;  %s1197_s21 = smov 0  }
   0x7 LB: > { %s175_s24 = sshll.u32 %s1358_s1, 4  ;;  %s1215_s25 = sadd.s32 4294967295, %s1152_s21   ;;  %s1152_s21 = sphi %s1197_s21, %s1373_s21   ;;  %s1148_s20 = sphi %s1195_s20, %s1372_s20   ;;  %s1144_s19 = sphi %s1193_s19, %s1371_s19   ;;  %s1140_s18 = sphi %s1191_s18, %s1370_s18   ;;  %s176_s24 = int_to_ptr.hbm [resolvable:$true] %s175_s24 }
   0x8   : > { %p699_p0 = scmp.ge.s32.totalorder %s1152_s21, 1  ;;  %p44_p1 = scmp.eq.s32.totalorder %s1215_s25, 0 }
   0x9   : > { %p164_p2 = scmp.lt.s32.totalorder %s1152_s21, 3  ;;  %s1154_s27 = smov [#allocation5]  }
   0xa   : > { %s177_s28 = sshll.u32 %s1154_s27, 4  ;;  %s190_s6 = sshll.u32 %s1359_s2, 4  ;;  %s178_s28 = int_to_ptr.vmem [resolvable:$true] %s177_s28  ;;  %s191_s6 = int_to_ptr.hbm [resolvable:$true] %s190_s6 }
   0xb   : > { %p1220_p3 = pnand %p699_p0, %p164_p2  ;;  %s201_s10 = sshll.u32 %s1360_s3, 4  ;;  %s202_s10 = int_to_ptr.hbm [resolvable:$true] %s201_s10 }
   0xc   : > { %s1155_s11 = smov [#allocation7]   ;;  %s1156_s13 = smov 128  }
   0xd   : > { %p892_p4 = pneg %p1220_p3  ;;  %s192_s12 = sshll.u32 %s1155_s11, 4  ;;  %s193_s12 = int_to_ptr.vmem [resolvable:$true] %s192_s12 }
   0xe   : > { %s1157_s14 = smov 8   ;;  %s1158_s15 = smov [#allocation8]  }
   0xf   : > { %p1232_p6 = pnand %p892_p4, %p44_p1  ;;  %s203_s16 = sshll.u32 %s1158_s15, 4  ;;  %s204_s16 = int_to_ptr.vmem [resolvable:$true] %s203_s16 }
  0x10   : > { %s1159_s17 = smov 64   ;;  %s1160_s22 = smov 4  }
  0x11   : > { %895 = dma.hbm_to_vmem [thread:$0]  (!%p1232_p6), %s176_s24, 2048, %s178_s28, [#allocation6], %s1156_s13, %s1156_s13, %s1157_s14  }
  0x12   : > { %898 = dma.hbm_to_vmem [thread:$0]  (!%p1232_p6), %s191_s6, 32, %s193_s12, [#allocation6]  }
  0x13   : > { %901 = dma.hbm_to_vmem [thread:$0]  (!%p1232_p6), %s202_s10, 2048, %s204_s16, [#allocation9], %s1159_s17, %s1159_s17, %s1160_s22  }
  0x14   : > { %s698_s23 = sadd.s32 4294967294, %s1152_s21   ;;  %s1247_s24 = sadd.s32 1, %s1152_s21  }
  0x15   : > { %s30_s27 = sadd.s32 1, %s1148_s20  ;;  %s27_s28 = ssub.s32 %s1152_s21, %s1247_s24 }
  0x16   : > { %p37_p7 = scmp.ne.s32.totalorder %s1148_s20, %s1144_s19  ;;  %p28_p8 = scmp.eq.s32.totalorder %s27_s28, 0 }
  0x17   : > { %p38_p9 = scmp.eq.s32.totalorder %s1152_s21, 0  ;;  %p43_p10 = scmp.ne.s32.totalorder %s1144_s19, %s1140_s18 }
  0x18   : > { %p151_p11 = scmp.eq.s32.totalorder %s1215_s25, 1  ;;  %p157_p0 = scmp.eq.s32.totalorder %s698_s23, 1 }
  0x19   : > { %s1259_s29 = scalar_select %p28_p8, %s1148_s20, %s30_s27  }
  0x1a   : > { %p1263_p12 = por %p44_p1, %p43_p10  ;;  %p1267_p13 = por %p151_p11, %p37_p7 }
  0x1b   : > { %p39_p2 = por %p38_p9, %p37_p7  ;;  %s220_s7 = sand.u32 1, %s1148_s20  }
  0x1c   : > { %p1272_p4 = por %p157_p0, %p43_p10  ;;  %p913_p6 = scmp.lt.s32.totalorder %s1152_s21, 2 }
  0x1d   : > { %s704_s9 = sshll.u32 %s220_s7, 3  ;;  %s705_s10 = sshll.u32 %s1152_s21, 3 }
  0x1e   : > { %s228_s13 = scalar_lea.hbm %s1357_s0, %s705_s10  ;;  %s224_s15 = scalar_lea.vmem [#allocation2], %s704_s9 }
  0x1f   : > { %s230_s14 = sshll.u32 %s228_s13, 4  ;;  %s232_s16 = sshll.u32 %s224_s15, 4  ;;  %s231_s14 = int_to_ptr.hbm [resolvable:$true] %s230_s14  ;;  %s233_s16 = int_to_ptr.vmem [resolvable:$true] %s232_s16 }
  0x20   : > { %p1281_p8 = pnand %p913_p6, %p39_p2  ;;  %s221_s22 = scalar_lea.sflag [#allocation3], %s220_s7 }
  0x21   : > { %s1048_s23 = sshra.s32 %s231_s14, 4  ;;  %s1055_s9 = scalar_lea.hbm %s1357_s0, 16  ;;  %s1049_s23 = int_to_ptr.hbm [resolvable:$true] %s1048_s23 }
  0x22   : > { %s1050_s27 = scalar_lea.hbm %s1049_s23, 8  ;;  %p1052_p9 = pneg %p1281_p8 }
  0x23   : > { %p1051_p7 = scmp.ne.s32.totalorder %s1049_s23, %s1050_s27  ;;  %p1056_p0 = scmp.lt.s32.totalorder %s1049_s23, %s1357_s0 }
  0x24   : > { %p1057_p2 = scmp.lt.s32.totalorder %s1055_s9, %s1050_s27 }
  0x25   : > { %p1053_p10 = pnand %p1052_p9, %p1051_p7 }
  0x26   : > { %p1058_p6 = por %p1057_p2, %p1056_p0 }
  0x27   : > { %p1054_p11 = pneg %p1053_p10 }
  0x29   : > { %p1059_p5 = pnand %p1058_p6, %p1054_p11 }
  0x2b   : > { %1062 = shalt.err (!%p1059_p5)
}
  0x2c   : > { %905 = dma.hbm_to_vmem [thread:$0]  (!%p1281_p8), %s231_s14, 128, %s233_s16, %s221_s22  }
  0x2d   : > { %241 = sbr.rel (%p1220_p3) target bundleno = 362 (0x16a), region = 40  ;;  %s1298_s7 = sand.u32 (!%p1220_p3), 1, %s1144_s19  }
  0x2e   : > { %s707_s13 = sshll.u32 (!%p1220_p3), %s1298_s7, 3  ;;  %s244_s15 = scalar_lea.sflag (!%p1220_p3), [#allocation3], %s1298_s7 }
  0x2f   : > { %s1304_s23 = scalar_lea.vmem (!%p1220_p3), [#allocation2], %s707_s13 }
  0x32   : > { %1123 = dma.done.wait (%p1263_p12), %s244_s15, 128  }
  0x33   : > { %1125 = vsyncadd (%p1263_p12), %s244_s15, 4294967168 }
  0x34   : > { %1127 = dma.done.wait (%p44_p1), [#allocation6], 2080  }
  0x35   : > { %1129 = vsyncadd (%p44_p1), [#allocation6], 4294965216 }
  0x36   : > { %1131 = dma.done.wait (%p44_p1), [#allocation9], 2048  }
  0x37   : > { %1133 = vsyncadd (%p44_p1), [#allocation9], 4294965248  ;;  %v770_v0 = vld [vmem:[#allocation5 + $0x70] sm:$0xf]  ;;  %v859_v1 = vld [vmem:[#allocation5 + $0x74] sm:$0xf0] }
  0x38   : > { %v858_v2 = vld [vmem:[#allocation5 + $0x74] sm:$0xf]  ;;  %v771_v3 = vor.u32 %v859_v1, %v770_v0  ;;  %v772_v4 = vld [vmem:[#allocation5 + $0x78] sm:$0xf0]  ;;  %v762_v5 = vld [vmem:[#allocation5 + $0x60] sm:$0xf] }
  0x39   : > { %v857_v6 = vld [vmem:[#allocation5 + $0x64] sm:$0xf0]  ;;  %v775_v7 = vor.u32 %v858_v2, %v772_v4  ;;  %v856_v8 = vld [vmem:[#allocation5 + $0x64] sm:$0xf]  ;;  %v764_v9 = vld [vmem:[#allocation5 + $0x68] sm:$0xf0] }
  0x3a   : > { %394 = vmatpush.bf16.msra.mxu0 %v771_v3  ;;  %v763_v10 = vor.u32 %v857_v6, %v762_v5  ;;  %v767_v11 = vor.u32 %v856_v8, %v764_v9  ;;  %v754_v12 = vld [vmem:[#allocation5 + $0x50] sm:$0xf]  ;;  %v855_v13 = vld [vmem:[#allocation5 + $0x54] sm:$0xf0]  ;;  %v854_v14 = vld [vmem:[#allocation5 + $0x54] sm:$0xf] }
  0x3b   : > { %407 = vmatpush.bf16.msra.mxu1 %v775_v7  ;;  %v756_v15 = vld [vmem:[#allocation5 + $0x58] sm:$0xf0]  ;;  %v755_v16 = vor.u32 %v855_v13, %v754_v12  ;;  %v746_v18 = vld [vmem:[#allocation5 + $0x40] sm:$0xf]  ;;  %v853_v19 = vld [vmem:[#allocation5 + $0x44] sm:$0xf0] }
  0x3c   : > { %v759_v17 = vor.u32 %v854_v14, %v756_v15  ;;  %v852_v20 = vld [vmem:[#allocation5 + $0x44] sm:$0xf]  ;;  %v748_v21 = vld [vmem:[#allocation5 + $0x48] sm:$0xf0]  ;;  %v747_v22 = vor.u32 %v853_v19, %v746_v18  ;;  %v867_v23 = vld [vmem:[#allocation8 + $0x38] sm:$0xff]  ;;  %s841_s26 = sshll.u32 %s1215_s25, 3 }
  0x3d   : > { %v875_v24 = vld [vmem:[#allocation8 + $0x78] sm:$0xff]  ;;  %v751_v25 = vor.u32 %v852_v20, %v748_v21  ;;  %v738_v26 = vld [vmem:[#allocation5 + $0x30] sm:$0xf]  ;;  %v850_v28 = vld [vmem:[#allocation5 + $0x34] sm:$0xf]  ;;  %556 = vmatpush.bf16.msra.mxu2 %v867_v23  ;;  %s594_s22 = scalar_lea.hbm %s1362_s5, %s841_s26  ;;  %s289_s27 = scalar_lea.vmem [#allocation10], %s707_s13 }
  0x3e   : > { %395 = vmatpush.bf16.msra.mxu0 %v763_v10  ;;  %v851_v27 = vld [vmem:[#allocation5 + $0x34] sm:$0xf0]  ;;  %v740_v29 = vld [vmem:[#allocation5 + $0x38] sm:$0xf0]  ;;  %569 = vmatpush.bf16.msra.mxu3 %v875_v24  ;;  %v730_v34 = vld [vmem:[#allocation5 + $0x20] sm:$0xf] }
  0x3f   : > { %408 = vmatpush.bf16.msra.mxu1 %v767_v11  ;;  %v866_v30 = vld [vmem:[#allocation8 + $0x30] sm:$0xff]  ;;  %v739_v32 = vor.u32 %v851_v27, %v738_v26  ;;  %v743_v33 = vor.u32 %v850_v28, %v740_v29  ;;  %v849_v35 = vld [vmem:[#allocation5 + $0x24] sm:$0xf0]  ;;  %v848_v36 = vld [vmem:[#allocation5 + $0x24] sm:$0xf]  ;;  %s596_s28 = sshll.u32 %s289_s27, 4  ;;  %s597_s28 = int_to_ptr.vmem [resolvable:$true] %s596_s28 }
  0x40   : > { %v874_v31 = vld [vmem:[#allocation8 + $0x70] sm:$0xff]  ;;  %v732_v37 = vld [vmem:[#allocation5 + $0x28] sm:$0xf0]  ;;  %v731_v40 = vor.u32 %v849_v35, %v730_v34  ;;  %v724_v45 = vld [vmem:[#allocation5 + $0x18] sm:$0xf0]  ;;  %s598_s10 = sshll.u32 %s594_s22, 4  ;;  %s599_s10 = int_to_ptr.hbm [resolvable:$true] %s598_s10 }
  0x41   : > { %557 = vmatpush.bf16.msra.mxu2 %v866_v30  ;;  %v865_v38 = vld [vmem:[#allocation8 + $0x28] sm:$0xff]  ;;  %v735_v41 = vor.u32 %v848_v36, %v732_v37  ;;  %v847_v43 = vld [vmem:[#allocation5 + $0x14] sm:$0xf0]  ;;  %v846_v44 = vld [vmem:[#allocation5 + $0x14] sm:$0xf]  ;;  %s584_s25 = scalar_lea.sflag [#allocation4], %s1298_s7 }
  0x42   : > { %396 = vmatpush.bf16.msra.mxu0 %v755_v16  ;;  %570 = vmatpush.bf16.msra.mxu3 %v874_v31  ;;  %v873_v39 = vld [vmem:[#allocation8 + $0x68] sm:$0xff]  ;;  %v864_v46 = vld [vmem:[#allocation8 + $0x20] sm:$0xff]  ;;  %v727_v49 = vor.u32 %v846_v44, %v724_v45  ;;  %v863_v54 = vld [vmem:[#allocation8 + $0x18] sm:$0xff]  ;;  %s1092_s9 = sshra.s32 %s599_s10, 4  ;;  %s1098_s13 = scalar_lea.hbm %s1362_s5, 16  ;;  %s1093_s9 = int_to_ptr.hbm [resolvable:$true] %s1092_s9 }
  0x43   : > { %409 = vmatpush.bf16.msra.mxu1 %v759_v17  ;;  %v722_v42 = vld [vmem:[#allocation5 + $0x10] sm:$0xf]  ;;  %v872_v47 = vld [vmem:[#allocation8 + $0x60] sm:$0xff]  ;;  %v716_v53 = vld [vmem:[#allocation5 + $0x8] sm:$0xf0]  ;;  %s1094_s11 = scalar_lea.hbm %s1093_s9, 8  ;;  %p1099_p12 = scmp.lt.s32.totalorder %s1093_s9, %s1362_s5 }
  0x44   : > { %v723_v48 = vor.u32 %v847_v43, %v722_v42  ;;  %v714_v50 = vld [vmem:[#allocation5] sm:$0xf]  ;;  %v845_v51 = vld [vmem:[#allocation5 + $0x4] sm:$0xf0]  ;;  %v844_v52 = vld [vmem:[#allocation5 + $0x4] sm:$0xf]  ;;  %p1095_p1 = scmp.ne.s32.totalorder %s1093_s9, %s1094_s11  ;;  %p1100_p8 = scmp.lt.s32.totalorder %s1098_s13, %s1094_s11 }
  0x45   : > { %558 = vmatpush.bf16.msra.mxu2 %v865_v38  ;;  %v871_v55 = vld [vmem:[#allocation8 + $0x58] sm:$0xff]  ;;  %v715_v56 = vor.u32 %v845_v51, %v714_v50  ;;  %v719_v58 = vor.u32 %v844_v52, %v716_v53  ;;  %v862_v59 = vld [vmem:[#allocation8 + $0x10] sm:$0xff]  ;;  %v861_v62 = vld [vmem:[#allocation8 + $0x8] sm:$0xff] }
  0x46   : > { %397 = vmatpush.bf16.msra.mxu0 %v747_v22  ;;  %571 = vmatpush.bf16.msra.mxu3 %v873_v39  ;;  %v290_v57 = vld [vmem:[%s1304_s23] sm:$0xff]  ;;  %v860_v0 = vld [vmem:[#allocation8] sm:$0xff]  ;;  %v308_v2 = vld [vmem:[#allocation7] sm:$0x3]  ;;  %p1096_p3 = pnand %p1095_p1, %p1267_p13  ;;  %p1101_p7 = por %p1100_p8, %p1099_p12 }
  0x47   : > { %410 = vmatpush.bf16.msra.mxu1 %v751_v25  ;;  %v870_v60 = vld [vmem:[#allocation8 + $0x50] sm:$0xff]  ;;  %v291_v61 = vpack.c.bf16 %v290_v57, %v290_v57  ;;  %v869_v63 = vld [vmem:[#allocation8 + $0x48] sm:$0xff]  ;;  %v868_v1 = vld [vmem:[#allocation8 + $0x40] sm:$0xff]  ;;  %v310_v3 = vperm.slane %v308_v2, 0  ;;  %v311_v4 = vperm.slane %v308_v2, 1 }
  0x48   : > { %v957_v15 = vld [vmem:[%s1361_s4] ss:$0 sm:$0xff]  ;;  %p1097_p5 = pneg %p1096_p3 }
  0x49   : > { %559 = vmatpush.bf16.msra.mxu2 %v864_v46 }
  0x4a   : > { %398 = vmatpush.bf16.msra.mxu0 %v739_v32  ;;  %572 = vmatpush.bf16.msra.mxu3 %v872_v47  ;;  %p1102_p9 = pnand %p1101_p7, %p1097_p5 }
  0x4b   : > { %411 = vmatpush.bf16.msra.mxu1 %v743_v33 }
  0x4d   : > { %560 = vmatpush.bf16.msra.mxu2 %v863_v54 }
  0x4e   : > { %399 = vmatpush.bf16.msra.mxu0 %v731_v40  ;;  %573 = vmatpush.bf16.msra.mxu3 %v871_v55 }
  0x4f   : > { %412 = vmatpush.bf16.msra.mxu1 %v735_v41 }
  0x51   : > { %561 = vmatpush.bf16.msra.mxu2 %v862_v59 }
  0x52   : > { %400 = vmatpush.bf16.msra.mxu0 %v723_v48  ;;  %574 = vmatpush.bf16.msra.mxu3 %v870_v60 }
  0x53   : > { %413 = vmatpush.bf16.msra.mxu1 %v727_v49 }
  0x55   : > { %562 = vmatpush.bf16.msra.mxu2 %v861_v62 }
  0x56   : > { %401 = vmatpush.bf16.msra.mxu0 %v715_v56  ;;  %575 = vmatpush.bf16.msra.mxu3 %v869_v63 }
  0x57   : > { %414 = vmatpush.bf16.msra.mxu1 %v719_v58 }
  0x59   : > { %402 = vmatmul.bf16.vlgmr.msra.gmra.mxu0 %v291_v61  ;;  %563 = vmatpush.bf16.msra.mxu2 %v860_v0 }
  0x5a   : > { %415 = vmatmul.bf16.vlgmr.msra.gmra.mxu1 %v291_v61  ;;  %576 = vmatpush.bf16.msra.mxu3 %v868_v1 }
  0xd6   : > { %v403_v5 = vpop.f32.mrf.mxu0 }
  0xd7   : > { %v404_v6 = vadd.f32 %v403_v5, %v310_v3  ;;  %v416_v7 = vpop.f32.mrf.mxu1 }
  0xd8   : > { %v417_v8 = vadd.f32 %v416_v7, %v311_v4 }
  0xd9   : > { %v420_v9 = vmax.f32 %v404_v6, 0.0 }
  0xda   : > { %v421_v10 = vmax.f32 %v417_v8, 0.0 }
  0xdb   : > { %v422_v11 = vpack.c.bf16 %v420_v9, %v420_v9 }
  0xdc   : > { %v423_v12 = vpack.c.bf16 %v421_v10, %v421_v10 }
  0xdd   : > { %564 = vmatmul.bf16.vlgmr.msra.gmra.mxu2 %v422_v11 }
  0xde   : > { %577 = vmatmul.bf16.vlgmr.msra.gmra.mxu3 %v423_v12  ;;  %v405_v13 = vpop.f32.mrf.mxu0 }
  0xdf   : > { %v418_v14 = vpop.f32.mrf.mxu1 }
 0x160   : > { %v565_v16 = vpop.f32.mrf.mxu2 }
 0x161   : > { %v566_v17 = vadd.f32 %v957_v15, %v565_v16  ;;  %v578_v18 = vpop.f32.mrf.mxu3 }
 0x163   : > { %v579_v19 = vadd.f32 %v578_v18, %v566_v17 }
 0x165   : > { %582 = vst [vmem:[%s289_s27] sm:$0xff] %v579_v19 }
 0x166   : > { %1105 = shalt.err (!%p1102_p9)
}
 0x167   : > { %890 = dma.vmem_to_hbm [thread:$0]  (%p1267_p13), %s597_s28, 128, %s599_s10, %s584_s25  }
 0x168   : > { %v567_v20 = vpop.f32.mrf.mxu2 }
 0x169   : > { %v580_v21 = vpop.f32.mrf.mxu3 }
 0x16a PF: > { %s610_s7 = sand.u32 1, %s1140_s18   ;;  %p1369_p10 = scmp.ge.s32.totalorder %s1152_s21, 2 }
 0x16b   : > { %s611_s30 = scalar_lea.sflag [#allocation4], %s610_s7 }
 0x16c   : > { %p907_p11 = pnand %p1369_p10, %p1272_p4 }
 0x16e   : > { %p908_p0 = pneg %p907_p11 }
 0x170   : > { %1135 = dma.done.wait (%p908_p0), %s611_s30, 128  }
 0x171   : > { %1137 = vsyncadd (%p908_p0), %s611_s30, 4294967168  ;;  %p20_p13 = scmp.ge.s32.totalorder %s1247_s24, 4   ;;  %s1370_s18 = smov %s1144_s19 }
 0x172   : > { %s1371_s19 = smov %s1148_s20  ;;  %s1372_s20 = smov %s1259_s29 }
 0x173   : > { %s1373_s21 = smov %s1247_s24  ;;  %22 = sbr.rel (!%p20_p13) target bundleno = 7 (0x7), region = 97 }
 0x178   :  { %617 = vsyncpa [#allocation3], 1 }
 0x179   :  { %619 = vsyncpa [#allocation3 + $0x1], 1 }
 0x17a   :  { %620 = vsyncpa [#allocation6], 1 }
 0x17b   :  { %621 = vsyncpa [#allocation9], 1 }
 0x17c   :  { %622 = vsyncpa [#allocation4], 1 }
 0x17d   :  { %624 = vsyncpa [#allocation4 + $0x1], 1 }

</bundles_post_ra>
